<compile_context>
chip_gen: v6e
topology: v6e:2x2x1
jax: 0.10.0
libtpu: 0.0.40
codegen_flags: <defaults>
</compile_context>

<pallas_src>
import math
import functools

import jax
import jax.numpy as jnp
from jax.experimental import pallas as pl
from jax.experimental.pallas import tpu as pltpu

_INV_SQRT2 = 1.0 / math.sqrt(2.0)
_MIB = 1024 * 1024


def _round_up(a: int, b: int) -> int:
    return ((a + b - 1) // b) * b


def _cdiv(a: int, b: int) -> int:
    return (a + b - 1) // b


def _vmem_capacity_bytes() -> int:
    """Best-effort per-TensorCore VMEM capacity; conservative fallback."""
    try:
        info = pltpu.get_tpu_info()
        cap = getattr(info, "vmem_capacity_bytes", None)
        if cap:
            return int(cap)
    except Exception:
        pass
    return 64 * _MIB  # v7x-sized conservative fallback


def _mlp_kernel(x_ref, w1_ref, b1_ref, w2_ref, b2_ref, o_ref, h_ref, *,
                approximate_gelu: bool, cast_dtype):
    # Stage 1 (only on the first N tile of each M tile): h = gelu(x @ w1 + b1).
    @pl.when(pl.program_id(1) == 0)
    def _():
        x = x_ref[...]
        w1 = w1_ref[...]
        if cast_dtype is not None:
            x = x.astype(cast_dtype)
            w1 = w1.astype(cast_dtype)
        h = jnp.dot(x, w1, preferred_element_type=jnp.float32)
        h = h + b1_ref[...].astype(jnp.float32)
        if approximate_gelu:
            # tanh approximation executes in the EUP slot (frees the VALU);
            # not bit-exact vs. torch.nn.GELU() default.
            c = 0.7978845608028654  # sqrt(2/pi)
            h = 0.5 * h * (1.0 + jnp.tanh(c * (h + 0.044715 * h * h * h)))
        else:
            # Exact erf-based GELU, matching torch.nn.GELU() default.
            h = 0.5 * h * (1.0 + jax.lax.erf(h * _INV_SQRT2))
        h_ref[...] = h.astype(h_ref.dtype)

    # Stage 2: one lane-aligned column tile of the second linear, reusing h.
    w2 = w2_ref[...]
    if cast_dtype is not None:
        w2 = w2.astype(cast_dtype)
    o = jnp.dot(h_ref[...], w2, preferred_element_type=jnp.float32)
    o = o + b2_ref[...].astype(jnp.float32)
    o_ref[...] = o.astype(o_ref.dtype)


@functools.partial(
    jax.jit,
    static_argnames=("tm", "tn", "w2_buffers", "vmem_limit",
                     "matmul_in_bf16", "approximate_gelu"))
def _feature_ir_layer_impl(x, w1, b1, w2, b2, *, tm, tn, w2_buffers,
                           vmem_limit, matmul_in_bf16, approximate_gelu):
    in_dim = x.shape[-1]
    out_dim = w1.shape[1]
    lead = x.shape[:-1]
    x2d = x.reshape(-1, in_dim)
    m = x2d.shape[0]

    # Zero-pad K of the first matmul and the hidden dim to multiples of 128
    # (numerically exact).  The output N dim stays unpadded: no post-kernel
    # slice copy, only the (possible) edge column tile pays a masked store.
    in_dim_p = _round_up(in_dim, 128)
    out_dim_p = _round_up(out_dim, 128)
    if in_dim_p != in_dim:
        x2d = jnp.pad(x2d, ((0, 0), (0, in_dim_p - in_dim)))
        w1 = jnp.pad(w1, ((0, in_dim_p - in_dim), (0, 0)))
    if out_dim_p != out_dim:
        w1 = jnp.pad(w1, ((0, 0), (0, out_dim_p - out_dim)))
        b1 = jnp.pad(b1, ((0, out_dim_p - out_dim),))
        w2 = jnp.pad(w2, ((0, out_dim_p - out_dim), (0, 0)))  # K rows only
    b1_row = b1.reshape(1, out_dim_p)
    b2_row = b2.reshape(1, out_dim)

    cast_dtype = jnp.bfloat16 if matmul_in_bf16 else None
    h_dtype = jnp.bfloat16 if matmul_in_bf16 else w1.dtype

    grid = (pl.cdiv(m, tm), pl.cdiv(out_dim, tn))

    kernel = functools.partial(_mlp_kernel,
                               approximate_gelu=approximate_gelu,
                               cast_dtype=cast_dtype)

    out = pl.pallas_call(
        kernel,
        out_shape=jax.ShapeDtypeStruct((m, out_dim), x.dtype),
        grid_spec=pltpu.PrefetchScalarGridSpec(
            num_scalar_prefetch=0,
            grid=grid,
            in_specs=[
                # x row tile (double-buffered by default).
                pl.BlockSpec((tm, in_dim_p), lambda i, n: (i, 0)),
                # Resident w1 / b1: constant block index -> single buffer.
                pl.BlockSpec((in_dim_p, out_dim_p), lambda i, n: (0, 0),
                             pipeline_mode=pl.Buffered(1)),
                pl.BlockSpec((1, out_dim_p), lambda i, n: (0, 0),
                             pipeline_mode=pl.Buffered(1)),
                # Streamed w2 column tile (2- or 3-deep pipeline).
                pl.BlockSpec((out_dim_p, tn), lambda i, n: (0, n),
                             pipeline_mode=pl.Buffered(w2_buffers)),
                # b2 column tile.
                pl.BlockSpec((1, tn), lambda i, n: (0, n)),
            ],
            out_specs=pl.BlockSpec((tm, tn), lambda i, n: (i, n)),
            scratch_shapes=[pltpu.VMEM((tm, out_dim_p), h_dtype)],  # h carry
        ),
        compiler_params=pltpu.CompilerParams(
            dimension_semantics=("parallel", "arbitrary"),
            vmem_limit_bytes=vmem_limit,
        ),
    )(x2d, w1, b1_row, w2, b2_row)

    return out.reshape(*lead, out_dim)


def feature_ir_layer(x, w1, b1, w2, b2, *, tile_m=None, tile_n=None,
                     matmul_in_bf16=False, approximate_gelu=False,
                     vmem_budget_bytes=None):
    """x: [..., in_dim] -> [..., out_dim]; semantics of FeatureIRLayer.forward."""
    in_dim = x.shape[-1]
    out_dim = w1.shape[1]
    m = int(math.prod(x.shape[:-1])) if x.shape[:-1] else 1

    x_bytes = jnp.dtype(x.dtype).itemsize
    w_bytes = jnp.dtype(w1.dtype).itemsize
    h_bytes = 2 if matmul_in_bf16 else w_bytes

    in_dim_p = _round_up(in_dim, 128)
    out_dim_p = _round_up(out_dim, 128)

    # Generation-aware VMEM policy.
    vmem_cap = _vmem_capacity_bytes()
    if vmem_cap >= 100 * _MIB:
        # v5e / v6e: 128 MiB VMEM, single TensorCore per chip.
        budget = 96 * _MIB if vmem_budget_bytes is None else vmem_budget_bytes
        limit_cap = 100 * _MIB
        num_tc = 1
        tile_m = 512 if tile_m is None else tile_m
        tile_n = 1024 if tile_n is None else tile_n
    else:
        # v7x-class: 64 MiB VMEM per TensorCore, 2 TCs per chip -> leave
        # headroom for Mosaic internal scratch / semaphores / pipeline slack.
        budget = 42 * _MIB if vmem_budget_bytes is None else vmem_budget_bytes
        limit_cap = 58 * _MIB
        num_tc = 2
        tile_m = 256 if tile_m is None else tile_m
        tile_n = 512 if tile_n is None else tile_n

    # Sublane alignment for the M tile (f32:8, bf16:16, int8/fp8:32).
    sub = {4: 8, 2: 16, 1: 32}.get(min(x_bytes, w_bytes, h_bytes), 8)

    # M tile: clamp to the problem, keep sublane aligned.
    tm = max(sub, _round_up(min(tile_m, _round_up(m, sub)), sub))
    # Megacore: the "parallel" M axis needs >= 2 tiles on 2-TC chips or one
    # TensorCore sits idle for small-batch / decode-shaped inputs.
    if num_tc >= 2 and _cdiv(m, tm) < 2 and m > sub:
        tm = max(sub, _round_up(_cdiv(m, 2), sub))

    # N tile (output columns): one full-width tile if it fits, otherwise the
    # largest lane-aligned multiple of 128.
    if out_dim <= tile_n:
        tn = out_dim
    else:
        tn = max(128, (min(tile_n, out_dim) // 128) * 128)

    def footprint(tm_, tn_, w2_buf):
        by = 2 * tm_ * in_dim_p * x_bytes           # x row tile (double-buffered)
        by += 1 * in_dim_p * out_dim_p * w_bytes    # w1 resident (Buffered(1))
        by += 1 * 8 * out_dim_p * w_bytes           # b1 resident (Buffered(1))
        by += w2_buf * out_dim_p * tn_ * w_bytes    # streamed w2 column tiles
        by += 2 * 8 * tn_ * w_bytes                 # b2 column tiles
        by += 2 * tm_ * tn_ * x_bytes               # output tiles
        by += tm_ * out_dim_p * h_bytes             # h scratch (single copy)
        return by

    # Shrink tn first, in 128-lane decrements (keeps the largest lane-dense tile).
    while footprint(tm, tn, 2) > budget and tn > 128:
        tn = max(128, ((tn - 1) // 128) * 128)
    # Then tm, floored at 256 to protect arithmetic intensity vs. the w2 stream.
    tm_floor = min(256, tm)
    while footprint(tm, tn, 2) > budget and tm > tm_floor:
        tm = max(tm_floor, _round_up(tm // 2, sub))
    # Last resort so we at least compile when the resident w1 dominates.
    # TODO(synk): stream w1 in K chunks (third grid axis / emit_pipeline) when
    # in_dim_p*out_dim_p*w_bytes alone approaches the VMEM budget.
    while footprint(tm, tn, 2) > budget and tm > sub:
        tm = max(sub, _round_up(tm // 2, sub))

    # Deepen the w2 column stream when it is long and VMEM allows.
    w2_buffers = 2
    if _cdiv(out_dim, tn) > 2 and footprint(tm, tn, 3) <= budget:
        w2_buffers = 3

    vmem_limit = int(min(max(1.35 * footprint(tm, tn, w2_buffers), 32 * _MIB),
                         limit_cap))

    return _feature_ir_layer_impl(
        x, w1, b1, w2, b2,
        tm=int(tm), tn=int(tn), w2_buffers=int(w2_buffers),
        vmem_limit=int(vmem_limit),
        matmul_in_bf16=bool(matmul_in_bf16),
        approximate_gelu=bool(approximate_gelu))


def init_params(key, in_dim, out_dim, dtype=jnp.float32):
    """Deterministic init mimicking nn.Linear defaults (uniform(-1/sqrt(fan_in), ..))."""
    k1, k2, k3, k4 = jax.random.split(key, 4)
    lim1 = 1.0 / math.sqrt(in_dim)
    lim2 = 1.0 / math.sqrt(out_dim)
    # Stored pre-transposed: [in, out] so the kernel does x @ w.
    w1 = jax.random.uniform(k1, (in_dim, out_dim), dtype, -lim1, lim1)
    b1 = jax.random.uniform(k2, (out_dim,), dtype, -lim1, lim1)
    w2 = jax.random.uniform(k3, (out_dim, out_dim), dtype, -lim2, lim2)
    b2 = jax.random.uniform(k4, (out_dim,), dtype, -lim2, lim2)
    return w1, b1, w2, b2


if __name__ == "__main__":
    key = jax.random.PRNGKey(0)
    kx, kp = jax.random.split(key)

    batch, seq, in_dim, out_dim = 2, 8, 32, 64
    x = jax.random.normal(kx, (batch, seq, in_dim), jnp.float32)
    w1, b1, w2, b2 = init_params(kp, in_dim, out_dim)

    out = feature_ir_layer(x, w1, b1, w2, b2)
    out = jax.block_until_ready(out)

    # Pure-JAX reference (exact erf GELU), matching torch.nn.GELU() default.
    h_ref = x.reshape(-1, in_dim) @ w1 + b1
    h_ref = 0.5 * h_ref * (1.0 + jax.lax.erf(h_ref / math.sqrt(2.0)))
    o_ref = (h_ref @ w2 + b2).reshape(batch, seq, out_dim)
    assert out.shape == (batch, seq, out_dim)
    assert jnp.allclose(out, o_ref, atol=1e-5, rtol=1e-5), float(
        jnp.max(jnp.abs(out - o_ref)))

    print("KERNEL_OK")
</pallas_src>

<mosaic_0001>
module attributes {stable_mosaic.version = 11 : i64} {
  func.func @_mlp_kernel(%arg0: i32, %arg1: i32, %arg2: memref<8x128xf32, #tpu.memory_space<vmem>>, %arg3: memref<128x128xf32, #tpu.memory_space<vmem>>, %arg4: memref<1x128xf32, #tpu.memory_space<vmem>>, %arg5: memref<128x64xf32, #tpu.memory_space<vmem>>, %arg6: memref<1x64xf32, #tpu.memory_space<vmem>>, %arg7: memref<8x64xf32, #tpu.memory_space<vmem>>, %arg8: memref<8x128xf32, #tpu.memory_space<vmem>>) attributes {dimension_semantics = [#tpu.dimension_semantics<parallel>, #tpu.dimension_semantics<arbitrary>], iteration_bounds = array<i64: 2, 1>, scalar_prefetch = 0 : i64, scratch_operands = 1 : i64, tpu.core_type = #tpu.core_type<tc>, window_params = [{transform_indices = @transform_0, window_bounds = array<i64: 8, 128>}, {pipeline_mode = #tpu.pipeline_mode<synchronous>, transform_indices = @transform_1, window_bounds = array<i64: 128, 128>}, {pipeline_mode = #tpu.pipeline_mode<synchronous>, transform_indices = @transform_2, window_bounds = array<i64: 1, 128>}, {pipeline_mode = #tpu.pipeline_mode<double_buffered>, transform_indices = @transform_3, window_bounds = array<i64: 128, 64>}, {transform_indices = @transform_4, window_bounds = array<i64: 1, 64>}, {transform_indices = @transform_5, window_bounds = array<i64: 8, 64>}]} {
    %c0_i32 = arith.constant 0 : i32
    %0 = arith.cmpi eq, %arg1, %c0_i32 : i32
    %1 = arith.extui %0 : i1 to i32
    %c0_i32_0 = arith.constant 0 : i32
    %2 = arith.cmpi ne, %1, %c0_i32_0 : i32
    scf.if %2 {
      %c0_8 = arith.constant 0 : index
      %c0_9 = arith.constant 0 : index
      %10 = vector.load %arg2[%c0_8, %c0_9] : memref<8x128xf32, #tpu.memory_space<vmem>>, vector<8x128xf32>
      %c0_10 = arith.constant 0 : index
      %c0_11 = arith.constant 0 : index
      %11 = vector.load %arg3[%c0_10, %c0_11] : memref<128x128xf32, #tpu.memory_space<vmem>>, vector<128x128xf32>
      %cst_12 = arith.constant dense<0.000000e+00> : vector<8x128xf32>
      %12 = tpu.matmul %10, %11, %cst_12 {dimension_numbers = #tpu.dot_dimension_numbers<[1], [0], [0], [1], [0, 0, 1, 1], [], []>} : vector<8x128xf32>, vector<128x128xf32>, vector<8x128xf32> -> vector<8x128xf32>
      %c0_13 = arith.constant 0 : index
      %c0_14 = arith.constant 0 : index
      %13 = vector.load %arg4[%c0_13, %c0_14] : memref<1x128xf32, #tpu.memory_space<vmem>>, vector<1x128xf32>
      %14 = vector.broadcast %13 : vector<1x128xf32> to vector<8x128xf32>
      %15 = arith.addf %12, %14 : vector<8x128xf32>
      %cst_15 = arith.constant 5.000000e-01 : f32
      %16 = vector.broadcast %cst_15 : f32 to vector<8x128xf32>
      %17 = arith.mulf %16, %15 : vector<8x128xf32>
      %cst_16 = arith.constant 0.707106769 : f32
      %18 = vector.broadcast %cst_16 : f32 to vector<8x128xf32>
      %19 = arith.mulf %15, %18 : vector<8x128xf32>
      %20 = math.erf %19 : vector<8x128xf32>
      %cst_17 = arith.constant 1.000000e+00 : f32
      %21 = vector.broadcast %cst_17 : f32 to vector<8x128xf32>
      %22 = arith.addf %21, %20 : vector<8x128xf32>
      %23 = arith.mulf %17, %22 : vector<8x128xf32>
      %c0_18 = arith.constant 0 : index
      %c0_19 = arith.constant 0 : index
      %24 = vector.load %arg8[%c0_18, %c0_19] : memref<8x128xf32, #tpu.memory_space<vmem>>, vector<8x128xf32>
      tpu.vector_store %arg8[%c0_18, %c0_19], %23 {strides = array<i32>} : memref<8x128xf32, #tpu.memory_space<vmem>>, vector<8x128xf32>,
    } else {
    }
    %c0 = arith.constant 0 : index
    %c0_1 = arith.constant 0 : index
    %3 = vector.load %arg5[%c0, %c0_1] : memref<128x64xf32, #tpu.memory_space<vmem>>, vector<128x64xf32>
    %c0_2 = arith.constant 0 : index
    %c0_3 = arith.constant 0 : index
    %4 = vector.load %arg8[%c0_2, %c0_3] : memref<8x128xf32, #tpu.memory_space<vmem>>, vector<8x128xf32>
    %cst = arith.constant dense<0.000000e+00> : vector<8x64xf32>
    %5 = tpu.matmul %4, %3, %cst {dimension_numbers = #tpu.dot_dimension_numbers<[1], [0], [0], [1], [0, 0, 1, 1], [], []>} : vector<8x128xf32>, vector<128x64xf32>, vector<8x64xf32> -> vector<8x64xf32>
    %c0_4 = arith.constant 0 : index
    %c0_5 = arith.constant 0 : index
    %6 = vector.load %arg6[%c0_4, %c0_5] : memref<1x64xf32, #tpu.memory_space<vmem>>, vector<1x64xf32>
    %7 = vector.broadcast %6 : vector<1x64xf32> to vector<8x64xf32>
    %8 = arith.addf %5, %7 : vector<8x64xf32>
    %c0_6 = arith.constant 0 : index
    %c0_7 = arith.constant 0 : index
    %9 = vector.load %arg7[%c0_6, %c0_7] : memref<8x64xf32, #tpu.memory_space<vmem>>, vector<8x64xf32>
    tpu.vector_store %arg7[%c0_6, %c0_7], %8 {strides = array<i32>} : memref<8x64xf32, #tpu.memory_space<vmem>>, vector<8x64xf32>,
    return
  }
  func.func @transform_0(%arg0: i32, %arg1: i32) -> (i32, i32) {
    %c0_i32 = arith.constant 0 : i32
    %c0_i32_0 = arith.constant 0 : i32
    return %arg0, %c0_i32 : i32, i32
  }
  func.func @transform_1(%arg0: i32, %arg1: i32) -> (i32, i32) {
    %c0_i32 = arith.constant 0 : i32
    %c0_i32_0 = arith.constant 0 : i32
    %c0_i32_1 = arith.constant 0 : i32
    return %c0_i32, %c0_i32_0 : i32, i32
  }
  func.func @transform_2(%arg0: i32, %arg1: i32) -> (i32, i32) {
    %c0_i32 = arith.constant 0 : i32
    %c0_i32_0 = arith.constant 0 : i32
    %c0_i32_1 = arith.constant 0 : i32
    return %c0_i32, %c0_i32_0 : i32, i32
  }
  func.func @transform_3(%arg0: i32, %arg1: i32) -> (i32, i32) {
    %c0_i32 = arith.constant 0 : i32
    %c0_i32_0 = arith.constant 0 : i32
    return %c0_i32, %arg1 : i32, i32
  }
  func.func @transform_4(%arg0: i32, %arg1: i32) -> (i32, i32) {
    %c0_i32 = arith.constant 0 : i32
    %c0_i32_0 = arith.constant 0 : i32
    return %c0_i32, %arg1 : i32, i32
  }
  func.func @transform_5(%arg0: i32, %arg1: i32) -> (i32, i32) {
    %c0_i32 = arith.constant 0 : i32
    return %arg0, %arg1 : i32, i32
  }
}

</mosaic_0001>

<bundles_post_ra>
// kernel: _feature_ir_layer_impl.1
= control target key start
LH: loop header
LB: loop body
LE: loop exit
PB: predicated region body
PF: predicated region fallthrough
CT: control target
= control target key end

     0   :  { %10 = vsyncpa [#allocation4], 0  ;;  %s1105_s0 = inlined_call_operand.vmem [shape: f32[16,128], index: 0, kind: input, shape index: {}]   ;;  %s1106_s1 = inlined_call_operand.vmem [shape: f32[128,128], index: 1, kind: input, shape index: {}]   ;;  %s1107_s2 = inlined_call_operand.vmem [shape: f32[1,128], index: 2, kind: input, shape index: {}]   ;;  %s1108_s3 = inlined_call_operand.vmem [shape: f32[128,64], index: 3, kind: input, shape index: {}]   ;;  %s1109_s4 = inlined_call_operand.vmem [shape: f32[1,64], index: 4, kind: input, shape index: {}]   ;;  %s1110_s5 = inlined_call_operand.hbm [shape: f32[16,64], index: 5, kind: output, shape index: {}]  }
   0x1   :  { %12 = vsyncpa [#allocation4 + $0x1], 0  ;;  %s864_s18 = smov 0   ;;  %s866_s19 = smov 0  }
   0x2   :  { %s868_s20 = smov 0   ;;  %s870_s21 = smov 0  }
   0x3   :  { %s872_s22 = smov 0   ;;  %s874_s23 = smov 0  }
   0x4 LB: > { %s575_s24 = sadd.s32 4294967295, %s829_s23   ;;  %s576_s25 = sadd.s32 4294967294, %s829_s23   ;;  %s829_s23 = sphi %s874_s23, %s18_s23   ;;  %s825_s22 = sphi %s872_s22, %s1117_s22   ;;  %s821_s21 = sphi %s870_s21, %s1116_s21   ;;  %s817_s20 = sphi %s868_s20, %s1115_s20   ;;  %s813_s19 = sphi %s866_s19, %s1114_s19   ;;  %s809_s18 = sphi %s864_s18, %s1113_s18  }
   0x5   : > { %s30_s26 = sadd.s32 1, %s825_s22  ;;  %s159_s27 = sadd.s32 1, %s817_s20 }
   0x6   : > { %p32_p0 = scmp.ge.s32.totalorder %s30_s26, 2  ;;  %p169_p1 = scmp.ne.s32.totalorder %s817_s20, %s813_s19 }
   0x7   : > { %p170_p2 = scmp.eq.s32.totalorder %s575_s24, 1  ;;  %p175_p3 = scmp.ne.s32.totalorder %s813_s19, %s809_s18 }
   0x8   : > { %s1119_s26 = smov (%p32_p0, %s30_s26), 0  ;;  %p176_p5 = scmp.eq.s32.totalorder %s576_s25, 1 }
   0x9   : > { %p904_p4 = por %p170_p2, %p169_p1  ;;  %s154_s29 = ssub.s32 %s825_s22, %s1119_s26 }
   0xa   : > { %p581_p6 = scmp.ge.s32.totalorder %s829_s23, 1  ;;  %p157_p7 = scmp.eq.s32.totalorder %s154_s29, 0 }
   0xb   : > { %p911_p8 = por %p176_p5, %p175_p3  ;;  %p220_p9 = scmp.lt.s32.totalorder %s829_s23, 3 }
   0xc   : > { %s917_s6 = scalar_select %p157_p7, %s817_s20, %s159_s27  }
   0xd   : > { %p221_p10 = pnand %p581_p6, %p220_p9 }
   0xe   : > { %p254_p11 = scmp.lt.s32.totalorder (!%p221_p10), %s821_s21, 1  ;;  %s251_s24 = sand.u32 (!%p221_p10), 1, %s813_s19  }
   0xf   : > { %224 = sbr.rel (%p221_p10) target bundleno = 476 (0x1dc), region = 40  ;;  %s466_s13 = scalar_lea.sflag (!%p221_p10), [#allocation4], %s251_s24 }
  0x14   : > { %v285_v0 = vld [vmem:[%s1106_s1 + $0x78] sm:$0xff]  ;;  %v831_v1 = vmov 0.0   ;;  %v284_v2 = vld [vmem:[%s1106_s1 + $0x70] sm:$0xff]  ;;  %vm832_vm0 = vmmov 0   ;;  %v283_v3 = vld [vmem:[%s1106_s1 + $0x68] sm:$0xff]  ;;  %s255_s7 = scalar_select %p254_p11, %s821_s21, 1 }
  0x15   : > { %624 = vmatprep.subr.mxu0 %v831_v1  ;;  %656 = vmatprep.mubr.msk.f32.mxu0 %vm832_vm0, %v831_v1  ;;  %v282_v4 = vld [vmem:[%s1106_s1 + $0x60] sm:$0xff]  ;;  %v384_v5 = vld [vmem:[%s1108_s3 + $0x78] sm:$0xff]  ;;  %v383_v6 = vld [vmem:[%s1108_s3 + $0x70] sm:$0xff]  ;;  %vm463_vm1 = vcmask 523264  }
  0x16   : > { %625 = vmatpush3.msra.mxu0 %v285_v0  ;;  %659 = vmatprep.subr.mxu1 %v831_v1  ;;  %v281_v7 = vld [vmem:[%s1106_s1 + $0x58] sm:$0xff]  ;;  %v382_v8 = vld [vmem:[%s1108_s3 + $0x68] sm:$0xff]  ;;  %v280_v9 = vld [vmem:[%s1106_s1 + $0x50] sm:$0xff]  ;;  %s583_s12 = sshll.u32 %s255_s7, 3  ;;  %s587_s7 = sshll.u32 %s821_s21, 7 }
  0x17   : > { %626 = vmatprep.subr.mxu0 %v831_v1  ;;  %691 = vmatprep.mubr.msk.f32.mxu1 %vm832_vm0, %v831_v1  ;;  %v381_v10 = vld [vmem:[%s1108_s3 + $0x60] sm:$0xff]  ;;  %v279_v11 = vld [vmem:[%s1106_s1 + $0x48] sm:$0xff]  ;;  %v277_v13 = vld [vmem:[%s1106_s1 + $0x38] sm:$0xff]  ;;  %s257_s25 = scalar_lea.vmem %s1105_s0, %s583_s12  ;;  %s1065_s12 = scalar_lea.hbm %s1110_s5, %s587_s7 }
  0x18   : > { %627 = vmatpush3.msra.mxu0 %v284_v2  ;;  %660 = vmatpush3.msra.mxu1 %v384_v5  ;;  %v278_v12 = vld [vmem:[%s1106_s1 + $0x40] sm:$0xff]  ;;  %v276_v14 = vld [vmem:[%s1106_s1 + $0x30] sm:$0xff]  ;;  %v275_v15 = vld [vmem:[%s1106_s1 + $0x28] sm:$0xff]  ;;  %s833_s21 = smov [#allocation3]  }
  0x19   : > { %628 = vmatprep.subr.mxu0 %v831_v1  ;;  %661 = vmatprep.subr.mxu1 %v831_v1  ;;  %v274_v16 = vld [vmem:[%s1106_s1 + $0x20] sm:$0xff]  ;;  %v273_v17 = vld [vmem:[%s1106_s1 + $0x18] sm:$0xff]  ;;  %v272_v18 = vld [vmem:[%s1106_s1 + $0x10] sm:$0xff]  ;;  %s757_s15 = sshll.u32 %s833_s21, 4  ;;  %s758_s15 = int_to_ptr.vmem [resolvable:$false] %s757_s15 }
  0x1a   : > { %629 = vmatpush3.msra.mxu0 %v283_v3  ;;  %662 = vmatpush3.msra.mxu1 %v383_v6  ;;  %v271_v19 = vld [vmem:[%s1106_s1 + $0x8] sm:$0xff]  ;;  %v270_v20 = vld [vmem:[%s1106_s1] sm:$0xff]  ;;  %v380_v22 = vld [vmem:[%s1108_s3 + $0x58] sm:$0xff]  ;;  %s759_s16 = scalar_lea.vmem %s758_s15, 256 }
  0x1b   : > { %630 = vmatprep.subr.mxu0 %v831_v1  ;;  %663 = vmatprep.subr.mxu1 %v831_v1  ;;  %v269_v21 = vld [vmem:[%s257_s25] sm:$0xff]  ;;  %v379_v23 = vld [vmem:[%s1108_s3 + $0x50] sm:$0xff]  ;;  %v378_v24 = vld [vmem:[%s1108_s3 + $0x48] sm:$0xff]  ;;  %s582_s25 = sshll.u32 %s251_s24, 3 }
  0x1c   : > { %631 = vmatpush3.msra.mxu0 %v282_v4  ;;  %664 = vmatpush3.msra.mxu1 %v382_v8  ;;  %v377_v25 = vld [vmem:[%s1108_s3 + $0x40] sm:$0xff]  ;;  %v376_v26 = vld [vmem:[%s1108_s3 + $0x38] sm:$0xff]  ;;  %v375_v27 = vld [vmem:[%s1108_s3 + $0x30] sm:$0xff]  ;;  %s253_s8 = scalar_lea.vmem [#allocation3], %s582_s25 }
  0x1d   : > { %632 = vmatprep.subr.mxu0 %v831_v1  ;;  %665 = vmatprep.subr.mxu1 %v831_v1  ;;  %v374_v28 = vld [vmem:[%s1108_s3 + $0x28] sm:$0xff]  ;;  %v373_v29 = vld [vmem:[%s1108_s3 + $0x20] sm:$0xff]  ;;  %v372_v30 = vld [vmem:[%s1108_s3 + $0x18] sm:$0xff]  ;;  %s480_s9 = sshll.u32 %s253_s8, 4  ;;  %s481_s9 = int_to_ptr.vmem [resolvable:$true] %s480_s9 }
  0x1e   : > { %633 = vmatpush3.msra.mxu0 %v281_v7  ;;  %666 = vmatpush3.msra.mxu1 %v381_v10  ;;  %v371_v31 = vld [vmem:[%s1108_s3 + $0x10] sm:$0xff]  ;;  %v370_v32 = vld [vmem:[%s1108_s3 + $0x8] sm:$0xff]  ;;  %v369_v33 = vld [vmem:[%s1108_s3] sm:$0xff]  ;;  %s753_s14 = scalar_lea.vmem %s481_s9, 128  ;;  %p760_p1 = scmp.lt.s32.totalorder %s481_s9, %s758_s15 }
  0x1f   : > { %634 = vmatprep.subr.mxu0 %v831_v1  ;;  %667 = vmatprep.subr.mxu1 %v831_v1  ;;  %v584_v34 = vld [vmem:[%s1107_s2] ss:$0 sm:$0xff]  ;;  %p754_p12 = scmp.ne.s32.totalorder %s481_s9, %s753_s14  ;;  %p761_p2 = scmp.lt.s32.totalorder %s759_s16, %s753_s14 }
  0x20   : > { %635 = vmatpush3.msra.mxu0 %v280_v9  ;;  %668 = vmatpush3.msra.mxu1 %v380_v22  ;;  %v585_v43 = vld [vmem:[%s1109_s4] ss:$0 sm:$0xff] }
  0x21   : > { %636 = vmatprep.subr.mxu0 %v831_v1  ;;  %669 = vmatprep.subr.mxu1 %v831_v1  ;;  %p755_p13 = pnand %p754_p12, %p904_p4  ;;  %p762_p3 = por %p761_p2, %p760_p1 }
  0x22   : > { %637 = vmatpush3.msra.mxu0 %v279_v11  ;;  %670 = vmatpush3.msra.mxu1 %v379_v23 }
  0x23   : > { %638 = vmatprep.subr.mxu0 %v831_v1  ;;  %671 = vmatprep.subr.mxu1 %v831_v1  ;;  %p756_p0 = pneg %p755_p13 }
  0x24   : > { %639 = vmatpush3.msra.mxu0 %v278_v12  ;;  %672 = vmatpush3.msra.mxu1 %v378_v24 }
  0x25   : > { %640 = vmatprep.subr.mxu0 %v831_v1  ;;  %673 = vmatprep.subr.mxu1 %v831_v1  ;;  %p763_p5 = pnand %p762_p3, %p756_p0 }
  0x26   : > { %641 = vmatpush3.msra.mxu0 %v277_v13  ;;  %674 = vmatpush3.msra.mxu1 %v377_v25 }
  0x27   : > { %642 = vmatprep.subr.mxu0 %v831_v1  ;;  %675 = vmatprep.subr.mxu1 %v831_v1 }
  0x28   : > { %643 = vmatpush3.msra.mxu0 %v276_v14  ;;  %676 = vmatpush3.msra.mxu1 %v376_v26 }
  0x29   : > { %644 = vmatprep.subr.mxu0 %v831_v1  ;;  %677 = vmatprep.subr.mxu1 %v831_v1 }
  0x2a   : > { %645 = vmatpush3.msra.mxu0 %v275_v15  ;;  %678 = vmatpush3.msra.mxu1 %v375_v27 }
  0x2b   : > { %646 = vmatprep.subr.mxu0 %v831_v1  ;;  %679 = vmatprep.subr.mxu1 %v831_v1 }
  0x2c   : > { %647 = vmatpush3.msra.mxu0 %v274_v16  ;;  %680 = vmatpush3.msra.mxu1 %v374_v28 }
  0x2d   : > { %648 = vmatprep.subr.mxu0 %v831_v1  ;;  %681 = vmatprep.subr.mxu1 %v831_v1 }
  0x2e   : > { %649 = vmatpush3.msra.mxu0 %v273_v17  ;;  %682 = vmatpush3.msra.mxu1 %v373_v29 }
  0x2f   : > { %650 = vmatprep.subr.mxu0 %v831_v1  ;;  %683 = vmatprep.subr.mxu1 %v831_v1 }
  0x30   : > { %651 = vmatpush3.msra.mxu0 %v272_v18  ;;  %684 = vmatpush3.msra.mxu1 %v372_v30 }
  0x31   : > { %652 = vmatprep.subr.mxu0 %v831_v1  ;;  %685 = vmatprep.subr.mxu1 %v831_v1 }
  0x32   : > { %653 = vmatpush3.msra.mxu0 %v271_v19  ;;  %686 = vmatpush3.msra.mxu1 %v371_v31 }
  0x33   : > { %654 = vmatprep.subr.mxu0 %v831_v1  ;;  %687 = vmatprep.subr.mxu1 %v831_v1 }
  0x34   : > { %655 = vmatpush3.msra.mxu0 %v270_v20  ;;  %688 = vmatpush3.msra.mxu1 %v370_v32 }
  0x35   : > { %657 = vmatmul.mubr.f32.vlgmr.msra.gmra.mxu0 %v269_v21  ;;  %689 = vmatprep.subr.mxu1 %v831_v1 }
  0x36   : > { %690 = vmatpush3.msra.mxu1 %v369_v33 }
  0xf5   : > { %v359_v35 = vpop.f32.mrf.mxu0 }
  0xf6   : > { %v360_v36 = vadd.f32 %v584_v34, %v359_v35 }
  0xf7   : > { %v658_v37 = vpop.f32.mrf.mxu0 }
  0xf8   : > { %v364_v38 = vmul.f32 0.70710677, %v360_v36  ;;  %v363_v40 = vmul.f32 0.5, %v360_v36 }
  0xfa   : > { %751 = verf.f32 %v364_v38 }
 0x107   : > { %v752_v39 = vpop.eup %751 }
 0x108   : > { %v366_v41 = vadd.f32 1.0, %v752_v39 }
 0x10a   : > { %v367_v42 = vmul.f32 %v366_v41, %v363_v40 }
 0x10c   : > { %692 = vmatmul.mubr.f32.vlgmr.msra.gmra.mxu1 %v367_v42 }
 0x1cc   : > { %v459_v44 = vpop.f32.mrf.mxu1 }
 0x1cd   : > { %v460_v45 = vadd.f32 %v585_v43, %v459_v44 }
 0x1ce   : > { %v693_v46 = vpop.f32.mrf.mxu1 }
 0x1cf   : > { %464 = vst.msk [vmem:[%s253_s8] sm:$0xff] %vm463_vm1, %v460_v45 }
 0x1d0   : > { %766 = shalt.err (!%p763_p5)
}
 0x1d1   : > { %s767_s17 = scalar_lea.hbm %s1065_s12, 128  ;;  %s771_s27 = scalar_lea.hbm %s1110_s5, 256 }
 0x1d2   : > { %p768_p6 = scmp.ne.s32.totalorder %s1065_s12, %s767_s17  ;;  %p772_p10 = scmp.lt.s32.totalorder %s1065_s12, %s1110_s5 }
 0x1d3   : > { %p773_p11 = scmp.lt.s32.totalorder %s771_s27, %s767_s17 }
 0x1d4   : > { %p769_p7 = pnand %p768_p6, %p904_p4 }
 0x1d5   : > { %p774_p12 = por %p773_p11, %p772_p10 }
 0x1d6   : > { %p770_p9 = pneg %p769_p7 }
 0x1d8   : > { %p775_p13 = pnand %p774_p12, %p770_p9 }
 0x1da   : > { %778 = shalt.err (!%p775_p13)
}
 0x1db   : > { %694 = dma.vmem_to_hbm [thread:$0]  (%p904_p4), %s481_s9, 128, %s1065_s12, %s466_s13  }
 0x1dc PF: > { %p700_p0 = scmp.ge.s32.totalorder %s829_s23, 2  ;;  %s492_s8 = sand.u32 1, %s809_s18  }
 0x1dd   : > { %s493_s10 = scalar_lea.sflag [#allocation4], %s492_s8 }
 0x1de   : > { %p697_p1 = pnand %p700_p0, %p911_p8 }
 0x1e0   : > { %p698_p2 = pneg %p697_p1 }
 0x1e2   : > { %804 = dma.done.wait (%p698_p2), %s493_s10, 128  }
 0x1e3   : > { %806 = vsyncadd (%p698_p2), %s493_s10, 4294967168  ;;  %s18_s23 = sadd.s32 1, %s829_s23   ;;  %s1113_s18 = smov %s813_s19 }
 0x1e4   : > { %p15_p3 = scmp.ge.s32.totalorder %s18_s23, 4   ;;  %s1114_s19 = smov %s817_s20 }
 0x1e5   : > { %s1115_s20 = smov %s917_s6  ;;  %s1116_s21 = smov %s825_s22 }
 0x1e6   : > { %s1117_s22 = smov %s1119_s26  ;;  %17 = sbr.rel (!%p15_p3) target bundleno = 4 (0x4), region = 85 }
 0x1eb   :  { %498 = vsyncpa [#allocation4], 1 }
 0x1ec   :  { %500 = vsyncpa [#allocation4 + $0x1], 1 }

</bundles_post_ra>
